<compile_context>
chip_gen: v6e
topology: v6e:2x2x1
jax: 0.10.0
libtpu: 0.0.40
codegen_flags: <defaults>
</compile_context>

<pallas_src>
import jax
import jax.numpy as jnp
from jax.experimental import pallas as pl
from jax.experimental.pallas import tpu as pltpu


def _make_lightconv_kernel(nb, c_in, c_out, lp, width, use_mxu):
    """Build the kernel body for `nb` images of a (C, Lp) flattened slab."""
    w = width

    def kernel(x_ref, w1_ref, w2_ref, bias_ref, mask_ref, o_ref):
        # x_ref:    (nb, c_in, lp)   activations (io dtype)
        # w1_ref:   (c_out, c_in)    1x1 conv weight (io dtype)
        # w2_ref:   (c_out, 9)       depthwise 3x3 taps with BN scale folded in (f32)
        # bias_ref: (c_out, 1)       folded BN bias (f32)
        # mask_ref: (4, lp)          [col_left, col_right, row_top, row_bot] validity
        # o_ref:    (nb, c_out, lp)
        cm_l = mask_ref[0:1, :]          # left  neighbour exists (dw = -1)
        cm_r = mask_ref[1:2, :]          # right neighbour exists (dw = +1)
        rm_t = mask_ref[2:3, :]          # top   neighbour exists (dh = -1)
        rm_b = mask_ref[3:4, :]          # bottom neighbour exists(dh = +1)
        # Hoisted broadcast (JAX does not CSE broadcast_in_dim inside loops).
        bias = jnp.broadcast_to(bias_ref[...], (c_out, lp))

        # Static unroll over the images in this block; every iteration ends in a
        # store to o_ref, which bounds the live ranges of its temporaries.
        for b in range(nb):
            # ---- 1x1 conv (f32 accumulation) ----
            if use_mxu:
                y0 = jnp.dot(w1_ref[...], x_ref[b],
                             preferred_element_type=jnp.float32)   # (c_out, lp)
            else:
                # C_in too small for useful MXU occupancy: VPU broadcast-MAC.
                xf = x_ref[b].astype(jnp.float32)
                w1f = w1_ref[...].astype(jnp.float32)
                y0 = w1f[:, 0:1] * xf[0:1, :]
                for k in range(1, c_in):
                    y0 = y0 + w1f[:, k:k + 1] * xf[k:k + 1, :]

            # ---- depthwise 3x3 + BN + ReLU ----
            # Column-shifted neighbours (XLU rolls; column masks kill the
            # circular wrap-around so zero-padding semantics hold).
            y_m = cm_l * pltpu.roll(y0, shift=1, axis=1)        # pixel (h, w-1)
            y_p = cm_r * pltpu.roll(y0, shift=lp - 1, axis=1)   # pixel (h, w+1)

            # dh = 0 row; accumulator starts at the folded BN bias.
            acc = bias + (w2_ref[:, 3:4] * y_m
                          + w2_ref[:, 4:5] * y0
                          + w2_ref[:, 5:6] * y_p)
            # dh = -1 row: combine taps at the source row, one roll by +W.
            top = (w2_ref[:, 0:1] * y_m
                   + w2_ref[:, 1:2] * y0
                   + w2_ref[:, 2:3] * y_p)
            acc = acc + rm_t * pltpu.roll(top, shift=w, axis=1)
            # dh = +1 row: one roll by -W (== lp - W circularly).
            bot = (w2_ref[:, 6:7] * y_m
                   + w2_ref[:, 7:8] * y0
                   + w2_ref[:, 8:9] * y_p)
            acc = acc + rm_b * pltpu.roll(bot, shift=lp - w, axis=1)

            o_ref[b] = jnp.maximum(acc, 0.0).astype(o_ref.dtype)

    return kernel


def _pick_batch_block(n, c_in, c_out, lp, io_bytes, budget=12 << 20):
    """Largest divisor of n whose per-step working set fits the VMEM budget,
    while keeping >= 2 grid steps (when possible) so v7x's 2 TCs both work."""
    per_img = ((c_in + c_out) * lp * io_bytes   # x + out blocks (single buffer)
               + 6 * c_out * lp * 4)            # f32 in-kernel temporaries
    cap = max(1, budget // max(per_img, 1))
    if n >= 2:
        cap = min(cap, max(1, n // 2))
    cap = int(min(cap, n))
    nb = 1
    for d in range(1, cap + 1):
        if n % d == 0:
            nb = d
    return nb


def light_conv3x3(x, conv1_w, conv2_w, gamma, beta, run_mean, run_var,
                  *, eps=1e-5, use_bf16_io=False):
    """LightConv3x3 forward (eval-mode BN).

    x:       (N, C_in, H, W)
    conv1_w: (C_out, C_in, 1, 1)   1x1 conv weight, bias=False
    conv2_w: (C_out, 1, 3, 3)      depthwise 3x3 weight (groups=C_out), bias=False
    """
    n, c_in, h, w = x.shape
    c_out = conv1_w.shape[0]
    l = h * w
    lp = ((l + 127) // 128) * 128            # lane-align flattened spatial dim

    io_dtype = jnp.bfloat16 if use_bf16_io else x.dtype
    io_bytes = jnp.dtype(io_dtype).itemsize

    # Fold eval-mode BN: scale into the depthwise taps, bias applied in-kernel.
    scale = gamma / jnp.sqrt(run_var + eps)                       # (C_out,)
    bias = beta - run_mean * scale                                # (C_out,)
    w1m = conv1_w.reshape(c_out, c_in).astype(io_dtype)           # (C_out, C_in)
    w2f = (conv2_w.reshape(c_out, 9) * scale[:, None]).astype(jnp.float32)
    bias2d = bias.reshape(c_out, 1).astype(jnp.float32)

    # Factored validity masks (zero-padding semantics): 2 column + 2 row rows.
    idx = jnp.arange(lp)
    col = idx % w
    row = idx // w
    valid = idx < l
    masks = jnp.stack([
        (col >= 1) & valid,          # left  neighbour exists (dw = -1)
        (col <= w - 2) & valid,      # right neighbour exists (dw = +1)
        (row >= 1) & valid,          # top   neighbour exists (dh = -1)
        (row <= h - 2) & valid,      # bottom neighbour exists(dh = +1)
    ], axis=0).astype(jnp.float32)                                # (4, Lp)

    # Native NCHW: (N, C, H, W) -> (N, C, H*W) is a free reshape; pad the lanes.
    x3 = x.reshape(n, c_in, l).astype(io_dtype)
    if lp != l:
        x3 = jnp.pad(x3, ((0, 0), (0, 0), (0, lp - l)))

    nb = _pick_batch_block(n, c_in, c_out, lp, io_bytes)
    grid = (n // nb,)
    use_mxu = c_in >= 8
    kernel = _make_lightconv_kernel(nb, c_in, c_out, lp, w, use_mxu)

    # Explicit VMEM budget with generous headroom, capped at v7x's 64 MiB.
    est = (2 * nb * (c_in + c_out) * lp * io_bytes            # double-buffered x/out
           + 2 * (c_out * (c_in + 10) + 4 * lp) * 4           # weights/bias/masks
           + 10 * c_out * lp * 4)                             # in-kernel temporaries
    vmem_limit = int(min(64 << 20, max(32 << 20, 2 * est)))

    out3 = pl.pallas_call(
        kernel,
        out_shape=jax.ShapeDtypeStruct((n, c_out, lp), io_dtype),
        grid_spec=pltpu.PrefetchScalarGridSpec(
            num_scalar_prefetch=0,
            grid=grid,
            in_specs=[
                pl.BlockSpec((nb, c_in, lp), lambda i: (i, 0, 0)),   # x block
                pl.BlockSpec((c_out, c_in), lambda i: (0, 0)),       # w1 (resident)
                pl.BlockSpec((c_out, 9), lambda i: (0, 0)),          # w2 * bn_scale
                pl.BlockSpec((c_out, 1), lambda i: (0, 0)),          # folded bn bias
                pl.BlockSpec((4, lp), lambda i: (0, 0)),             # validity masks
            ],
            out_specs=pl.BlockSpec((nb, c_out, lp), lambda i: (i, 0, 0)),
        ),
        compiler_params=pltpu.CompilerParams(
            dimension_semantics=("parallel",),
            vmem_limit_bytes=vmem_limit),
    )(x3, w1m, w2f, bias2d, masks)

    out3 = out3[:, :, :l].reshape(n, c_out, h, w)
    return out3.astype(x.dtype)


def _reference(x, w1, w2, gamma, beta, run_mean, run_var, eps=1e-5):
    """Pure-JAX reference (eval-mode BN), same op order as the PyTorch module."""
    n, c_in, h, w = x.shape
    c_out = w1.shape[0]
    y1 = jnp.einsum("nchw,oc->nohw", x, w1.reshape(c_out, c_in),
                    precision=jax.lax.Precision.HIGHEST)
    y1p = jnp.pad(y1, ((0, 0), (0, 0), (1, 1), (1, 1)))
    y2 = jnp.zeros((n, c_out, h, w), jnp.float32)
    for kh in range(3):
        for kw in range(3):
            tap = w2[:, 0, kh, kw][None, :, None, None]
            y2 = y2 + tap * y1p[:, :, kh:kh + h, kw:kw + w]
    y = (y2 - run_mean[None, :, None, None]) / jnp.sqrt(
        run_var[None, :, None, None] + eps)
    y = y * gamma[None, :, None, None] + beta[None, :, None, None]
    return jnp.maximum(y, 0.0)


if __name__ == "__main__":
    def make_inputs(key, n, c_in, c_out, h, w):
        ks = jax.random.split(key, 7)
        x = jax.random.normal(ks[0], (n, c_in, h, w), dtype=jnp.float32)
        w1 = jax.random.normal(ks[1], (c_out, c_in, 1, 1), dtype=jnp.float32) * 0.1
        w2 = jax.random.normal(ks[2], (c_out, 1, 3, 3), dtype=jnp.float32) * 0.1
        gamma = 1.0 + 0.1 * jax.random.normal(ks[3], (c_out,), dtype=jnp.float32)
        beta = 0.1 * jax.random.normal(ks[4], (c_out,), dtype=jnp.float32)
        rm = 0.05 * jax.random.normal(ks[5], (c_out,), dtype=jnp.float32)
        rv = jnp.abs(1.0 + 0.1 * jax.random.normal(ks[6], (c_out,), dtype=jnp.float32))
        return x, w1, w2, gamma, beta, rm, rv

    key = jax.random.PRNGKey(0)
    k1, k2 = jax.random.split(key)

    # Case 1: tiny channels (VPU broadcast-MAC 1x1 path), 16x16 (lane-aligned).
    args1 = make_inputs(k1, 2, 4, 8, 16, 16)
    out1 = jax.block_until_ready(light_conv3x3(*args1))
    ref1 = _reference(*args1)
    assert out1.shape == ref1.shape
    assert jnp.allclose(out1, ref1, atol=1e-3, rtol=1e-3), float(
        jnp.max(jnp.abs(out1 - ref1)))

    # Case 2: MXU 1x1 path, odd batch, 12x12 (144 lanes -> padded to 256).
    args2 = make_inputs(k2, 3, 16, 16, 12, 12)
    out2 = jax.block_until_ready(light_conv3x3(*args2))
    ref2 = _reference(*args2)
    assert out2.shape == ref2.shape
    assert jnp.allclose(out2, ref2, atol=2e-3, rtol=2e-3), float(
        jnp.max(jnp.abs(out2 - ref2)))

    # Case 3: bf16 activation I/O (f32 accumulate), looser tolerance.
    out3 = jax.block_until_ready(light_conv3x3(*args1, use_bf16_io=True))
    d3 = jnp.abs(out3.astype(jnp.float32) - ref1)
    assert jnp.allclose(out3.astype(jnp.float32), ref1, atol=5e-2, rtol=5e-2), float(
        jnp.max(d3))

    print("KERNEL_OK")
</pallas_src>

<mosaic_0001>
module attributes {stable_mosaic.version = 11 : i64} {
  func.func @kernel(%arg0: i32, %arg1: memref<1x4x256xf32, #tpu.memory_space<vmem>>, %arg2: memref<8x4xf32, #tpu.memory_space<vmem>>, %arg3: memref<8x9xf32, #tpu.memory_space<vmem>>, %arg4: memref<8x1xf32, #tpu.memory_space<vmem>>, %arg5: memref<4x256xf32, #tpu.memory_space<vmem>>, %arg6: memref<1x8x256xf32, #tpu.memory_space<vmem>>) attributes {dimension_semantics = [#tpu.dimension_semantics<parallel>], iteration_bounds = array<i64: 2>, scalar_prefetch = 0 : i64, scratch_operands = 0 : i64, tpu.core_type = #tpu.core_type<tc>, window_params = [{transform_indices = @transform_0, window_bounds = array<i64: 1, 4, 256>}, {pipeline_mode = #tpu.pipeline_mode<synchronous>, transform_indices = @transform_1, window_bounds = array<i64: 8, 4>}, {pipeline_mode = #tpu.pipeline_mode<synchronous>, transform_indices = @transform_2, window_bounds = array<i64: 8, 9>}, {pipeline_mode = #tpu.pipeline_mode<synchronous>, transform_indices = @transform_3, window_bounds = array<i64: 8, 1>}, {pipeline_mode = #tpu.pipeline_mode<synchronous>, transform_indices = @transform_4, window_bounds = array<i64: 4, 256>}, {transform_indices = @transform_5, window_bounds = array<i64: 1, 8, 256>}]} {
    %c0 = arith.constant 0 : index
    %c0_0 = arith.constant 0 : index
    %0 = vector.load %arg5[%c0, %c0_0] : memref<4x256xf32, #tpu.memory_space<vmem>>, vector<1x256xf32>
    %c1 = arith.constant 1 : index
    %c0_1 = arith.constant 0 : index
    %1 = vector.load %arg5[%c1, %c0_1] : memref<4x256xf32, #tpu.memory_space<vmem>>, vector<1x256xf32>
    %c2 = arith.constant 2 : index
    %c0_2 = arith.constant 0 : index
    %2 = vector.load %arg5[%c2, %c0_2] : memref<4x256xf32, #tpu.memory_space<vmem>>, vector<1x256xf32>
    %c3 = arith.constant 3 : index
    %c0_3 = arith.constant 0 : index
    %3 = vector.load %arg5[%c3, %c0_3] : memref<4x256xf32, #tpu.memory_space<vmem>>, vector<1x256xf32>
    %c0_4 = arith.constant 0 : index
    %c0_5 = arith.constant 0 : index
    %4 = vector.load %arg4[%c0_4, %c0_5] : memref<8x1xf32, #tpu.memory_space<vmem>>, vector<8x1xf32>
    %5 = vector.shape_cast %4 : vector<8x1xf32> to vector<8x1xf32>
    %6 = vector.broadcast %5 : vector<8x1xf32> to vector<8x256xf32>
    %c0_6 = arith.constant 0 : index
    %c0_7 = arith.constant 0 : index
    %c0_8 = arith.constant 0 : index
    %7 = vector.load %arg1[%c0_6, %c0_7, %c0_8] : memref<1x4x256xf32, #tpu.memory_space<vmem>>, vector<1x4x256xf32>
    %8 = vector.shape_cast %7 : vector<1x4x256xf32> to vector<4x256xf32>
    %c0_9 = arith.constant 0 : index
    %c0_10 = arith.constant 0 : index
    %9 = vector.load %arg2[%c0_9, %c0_10] : memref<8x4xf32, #tpu.memory_space<vmem>>, vector<8x4xf32>
    %10 = vector.extract_strided_slice %9 {offsets = [0, 0], sizes = [8, 1], strides = [1, 1]} : vector<8x4xf32> to vector<8x1xf32>
    %11 = vector.extract_strided_slice %8 {offsets = [0, 0], sizes = [1, 256], strides = [1, 1]} : vector<4x256xf32> to vector<1x256xf32>
    %12 = vector.broadcast %10 : vector<8x1xf32> to vector<8x256xf32>
    %13 = vector.broadcast %11 : vector<1x256xf32> to vector<8x256xf32>
    %14 = arith.mulf %12, %13 : vector<8x256xf32>
    %15 = vector.extract_strided_slice %9 {offsets = [0, 1], sizes = [8, 1], strides = [1, 1]} : vector<8x4xf32> to vector<8x1xf32>
    %16 = vector.extract_strided_slice %8 {offsets = [1, 0], sizes = [1, 256], strides = [1, 1]} : vector<4x256xf32> to vector<1x256xf32>
    %17 = vector.broadcast %15 : vector<8x1xf32> to vector<8x256xf32>
    %18 = vector.broadcast %16 : vector<1x256xf32> to vector<8x256xf32>
    %19 = arith.mulf %17, %18 : vector<8x256xf32>
    %20 = arith.addf %14, %19 : vector<8x256xf32>
    %21 = vector.extract_strided_slice %9 {offsets = [0, 2], sizes = [8, 1], strides = [1, 1]} : vector<8x4xf32> to vector<8x1xf32>
    %22 = vector.extract_strided_slice %8 {offsets = [2, 0], sizes = [1, 256], strides = [1, 1]} : vector<4x256xf32> to vector<1x256xf32>
    %23 = vector.broadcast %21 : vector<8x1xf32> to vector<8x256xf32>
    %24 = vector.broadcast %22 : vector<1x256xf32> to vector<8x256xf32>
    %25 = arith.mulf %23, %24 : vector<8x256xf32>
    %26 = arith.addf %20, %25 : vector<8x256xf32>
    %27 = vector.extract_strided_slice %9 {offsets = [0, 3], sizes = [8, 1], strides = [1, 1]} : vector<8x4xf32> to vector<8x1xf32>
    %28 = vector.extract_strided_slice %8 {offsets = [3, 0], sizes = [1, 256], strides = [1, 1]} : vector<4x256xf32> to vector<1x256xf32>
    %29 = vector.broadcast %27 : vector<8x1xf32> to vector<8x256xf32>
    %30 = vector.broadcast %28 : vector<1x256xf32> to vector<8x256xf32>
    %31 = arith.mulf %29, %30 : vector<8x256xf32>
    %32 = arith.addf %26, %31 : vector<8x256xf32>
    %c1_i32 = arith.constant 1 : i32
    %33 = tpu.dynamic_rotate %32 by %c1_i32 dim 1 : vector<8x256xf32>, i32 -> vector<8x256xf32>
    %34 = vector.broadcast %0 : vector<1x256xf32> to vector<8x256xf32>
    %35 = arith.mulf %34, %33 : vector<8x256xf32>
    %c255_i32 = arith.constant 255 : i32
    %36 = tpu.dynamic_rotate %32 by %c255_i32 dim 1 : vector<8x256xf32>, i32 -> vector<8x256xf32>
    %37 = vector.broadcast %1 : vector<1x256xf32> to vector<8x256xf32>
    %38 = arith.mulf %37, %36 : vector<8x256xf32>
    %c0_11 = arith.constant 0 : index
    %c3_12 = arith.constant 3 : index
    %39 = vector.load %arg3[%c0_11, %c3_12] : memref<8x9xf32, #tpu.memory_space<vmem>>, vector<8x1xf32>
    %40 = vector.broadcast %39 : vector<8x1xf32> to vector<8x256xf32>
    %41 = arith.mulf %40, %35 : vector<8x256xf32>
    %c0_13 = arith.constant 0 : index
    %c4 = arith.constant 4 : index
    %42 = vector.load %arg3[%c0_13, %c4] : memref<8x9xf32, #tpu.memory_space<vmem>>, vector<8x1xf32>
    %43 = vector.broadcast %42 : vector<8x1xf32> to vector<8x256xf32>
    %44 = arith.mulf %43, %32 : vector<8x256xf32>
    %45 = arith.addf %41, %44 : vector<8x256xf32>
    %c0_14 = arith.constant 0 : index
    %c5 = arith.constant 5 : index
    %46 = vector.load %arg3[%c0_14, %c5] : memref<8x9xf32, #tpu.memory_space<vmem>>, vector<8x1xf32>
    %47 = vector.broadcast %46 : vector<8x1xf32> to vector<8x256xf32>
    %48 = arith.mulf %47, %38 : vector<8x256xf32>
    %49 = arith.addf %45, %48 : vector<8x256xf32>
    %50 = arith.addf %6, %49 : vector<8x256xf32>
    %c0_15 = arith.constant 0 : index
    %c0_16 = arith.constant 0 : index
    %51 = vector.load %arg3[%c0_15, %c0_16] : memref<8x9xf32, #tpu.memory_space<vmem>>, vector<8x1xf32>
    %52 = vector.broadcast %51 : vector<8x1xf32> to vector<8x256xf32>
    %53 = arith.mulf %52, %35 : vector<8x256xf32>
    %c0_17 = arith.constant 0 : index
    %c1_18 = arith.constant 1 : index
    %54 = vector.load %arg3[%c0_17, %c1_18] : memref<8x9xf32, #tpu.memory_space<vmem>>, vector<8x1xf32>
    %55 = vector.broadcast %54 : vector<8x1xf32> to vector<8x256xf32>
    %56 = arith.mulf %55, %32 : vector<8x256xf32>
    %57 = arith.addf %53, %56 : vector<8x256xf32>
    %c0_19 = arith.constant 0 : index
    %c2_20 = arith.constant 2 : index
    %58 = vector.load %arg3[%c0_19, %c2_20] : memref<8x9xf32, #tpu.memory_space<vmem>>, vector<8x1xf32>
    %59 = vector.broadcast %58 : vector<8x1xf32> to vector<8x256xf32>
    %60 = arith.mulf %59, %38 : vector<8x256xf32>
    %61 = arith.addf %57, %60 : vector<8x256xf32>
    %c16_i32 = arith.constant 16 : i32
    %62 = tpu.dynamic_rotate %61 by %c16_i32 dim 1 : vector<8x256xf32>, i32 -> vector<8x256xf32>
    %63 = vector.broadcast %2 : vector<1x256xf32> to vector<8x256xf32>
    %64 = arith.mulf %63, %62 : vector<8x256xf32>
    %65 = arith.addf %50, %64 : vector<8x256xf32>
    %c0_21 = arith.constant 0 : index
    %c6 = arith.constant 6 : index
    %66 = vector.load %arg3[%c0_21, %c6] : memref<8x9xf32, #tpu.memory_space<vmem>>, vector<8x1xf32>
    %67 = vector.broadcast %66 : vector<8x1xf32> to vector<8x256xf32>
    %68 = arith.mulf %67, %35 : vector<8x256xf32>
    %c0_22 = arith.constant 0 : index
    %c7 = arith.constant 7 : index
    %69 = vector.load %arg3[%c0_22, %c7] : memref<8x9xf32, #tpu.memory_space<vmem>>, vector<8x1xf32>
    %70 = vector.broadcast %69 : vector<8x1xf32> to vector<8x256xf32>
    %71 = arith.mulf %70, %32 : vector<8x256xf32>
    %72 = arith.addf %68, %71 : vector<8x256xf32>
    %c0_23 = arith.constant 0 : index
    %c8 = arith.constant 8 : index
    %73 = vector.load %arg3[%c0_23, %c8] : memref<8x9xf32, #tpu.memory_space<vmem>>, vector<8x1xf32>
    %74 = vector.broadcast %73 : vector<8x1xf32> to vector<8x256xf32>
    %75 = arith.mulf %74, %38 : vector<8x256xf32>
    %76 = arith.addf %72, %75 : vector<8x256xf32>
    %c240_i32 = arith.constant 240 : i32
    %77 = tpu.dynamic_rotate %76 by %c240_i32 dim 1 : vector<8x256xf32>, i32 -> vector<8x256xf32>
    %78 = vector.broadcast %3 : vector<1x256xf32> to vector<8x256xf32>
    %79 = arith.mulf %78, %77 : vector<8x256xf32>
    %80 = arith.addf %65, %79 : vector<8x256xf32>
    %cst = arith.constant 0.000000e+00 : f32
    %81 = vector.broadcast %cst : f32 to vector<8x256xf32>
    %82 = arith.maximumf %80, %81 : vector<8x256xf32>
    %c0_24 = arith.constant 0 : index
    %c0_25 = arith.constant 0 : index
    %c0_26 = arith.constant 0 : index
    %83 = vector.load %arg6[%c0_24, %c0_25, %c0_26] : memref<1x8x256xf32, #tpu.memory_space<vmem>>, vector<1x8x256xf32>
    %84 = vector.shape_cast %83 : vector<1x8x256xf32> to vector<8x256xf32>
    %85 = vector.shape_cast %82 : vector<8x256xf32> to vector<1x8x256xf32>
    tpu.vector_store %arg6[%c0_24, %c0_25, %c0_26], %85 {strides = array<i32>} : memref<1x8x256xf32, #tpu.memory_space<vmem>>, vector<1x8x256xf32>,
    return
  }
  func.func @transform_0(%arg0: i32) -> (i32, i32, i32) {
    %c0_i32 = arith.constant 0 : i32
    %c0_i32_0 = arith.constant 0 : i32
    %c0_i32_1 = arith.constant 0 : i32
    return %arg0, %c0_i32, %c0_i32_0 : i32, i32, i32
  }
  func.func @transform_1(%arg0: i32) -> (i32, i32) {
    %c0_i32 = arith.constant 0 : i32
    %c0_i32_0 = arith.constant 0 : i32
    %c0_i32_1 = arith.constant 0 : i32
    return %c0_i32, %c0_i32_0 : i32, i32
  }
  func.func @transform_2(%arg0: i32) -> (i32, i32) {
    %c0_i32 = arith.constant 0 : i32
    %c0_i32_0 = arith.constant 0 : i32
    %c0_i32_1 = arith.constant 0 : i32
    return %c0_i32, %c0_i32_0 : i32, i32
  }
  func.func @transform_3(%arg0: i32) -> (i32, i32) {
    %c0_i32 = arith.constant 0 : i32
    %c0_i32_0 = arith.constant 0 : i32
    %c0_i32_1 = arith.constant 0 : i32
    return %c0_i32, %c0_i32_0 : i32, i32
  }
  func.func @transform_4(%arg0: i32) -> (i32, i32) {
    %c0_i32 = arith.constant 0 : i32
    %c0_i32_0 = arith.constant 0 : i32
    %c0_i32_1 = arith.constant 0 : i32
    return %c0_i32, %c0_i32_0 : i32, i32
  }
  func.func @transform_5(%arg0: i32) -> (i32, i32, i32) {
    %c0_i32 = arith.constant 0 : i32
    %c0_i32_0 = arith.constant 0 : i32
    %c0_i32_1 = arith.constant 0 : i32
    return %arg0, %c0_i32, %c0_i32_0 : i32, i32, i32
  }
}

</mosaic_0001>

<bundles_post_ra>
// kernel: tpu_custom_call.1
= control target key start
LH: loop header
LB: loop body
LE: loop exit
PB: predicated region body
PF: predicated region fallthrough
CT: control target
= control target key end

     0   :  { %10 = vsyncpa [#allocation3], 0  ;;  %s1011_s0 = inlined_call_operand.vmem [shape: f32[2,4,256], index: 0, kind: input, shape index: {}]   ;;  %s1012_s1 = inlined_call_operand.vmem [shape: f32[8,4], index: 1, kind: input, shape index: {}]   ;;  %s1013_s2 = inlined_call_operand.vmem [shape: f32[8,9], index: 2, kind: input, shape index: {}]   ;;  %s1014_s3 = inlined_call_operand.vmem [shape: f32[8,1], index: 3, kind: input, shape index: {}]   ;;  %s1015_s4 = inlined_call_operand.hbm [shape: f32[4,256], index: 4, kind: input, shape index: {}]   ;;  %s1016_s5 = inlined_call_operand.hbm [shape: f32[2,8,256], index: 5, kind: output, shape index: {}]  }
   0x1   :  { %11 = vsyncpa [#allocation4], 0 }
   0x2   :  { %13 = vsyncpa [#allocation4 + $0x1], 0  ;;  %s831_s18 = smov 0   ;;  %s833_s19 = smov 0  }
   0x3   :  { %s835_s20 = smov 0   ;;  %s837_s21 = smov 0  }
   0x4 LB: > { %s852_s22 = sadd.s32 4294967295, %s784_s21   ;;  %s601_s23 = sadd.s32 4294967294, %s784_s21   ;;  %s784_s21 = sphi %s837_s21, %s1024_s21   ;;  %s780_s20 = sphi %s835_s20, %s1023_s20   ;;  %s776_s19 = sphi %s833_s19, %s1022_s19   ;;  %s772_s18 = sphi %s831_s18, %s1021_s18  }
   0x5   : > { %s856_s24 = sadd.s32 1, %s784_s21   ;;  %s136_s25 = sadd.s32 1, %s780_s20 }
   0x6   : > { %s133_s26 = ssub.s32 %s784_s21, %s856_s24  ;;  %p146_p0 = scmp.ne.s32.totalorder %s780_s20, %s776_s19 }
   0x7   : > { %p134_p1 = scmp.eq.s32.totalorder %s133_s26, 0  ;;  %p147_p2 = scmp.eq.s32.totalorder %s852_s22, 1 }
   0x8   : > { %p152_p3 = scmp.ne.s32.totalorder %s776_s19, %s772_s18  ;;  %p153_p4 = scmp.eq.s32.totalorder %s601_s23, 1 }
   0x9   : > { %s867_s27 = scalar_select %p134_p1, %s780_s20, %s136_s25  }
   0xa   : > { %p869_p5 = por %p147_p2, %p146_p0  ;;  %p873_p6 = por %p153_p4, %p152_p3 }
   0xb   : > { %p602_p7 = scmp.ge.s32.totalorder %s784_s21, 1  ;;  %p160_p8 = scmp.lt.s32.totalorder %s784_s21, 3 }
   0xc   : > { %s1018_s29 = scalar_select %p873_p6, 1, 0 }
   0xd   : > { %p631_p9 = scmp.eq.s32.totalorder %s852_s22, 0  ;;  %p880_p10 = pnand %p602_p7, %p160_p8 }
   0xe   : > { %s786_s6 = smov [#allocation2]  }
   0xf   : > { %s182_s7 = sshll.u32 %s786_s6, 4  ;;  %p623_p11 = pneg %p880_p10  ;;  %s183_s7 = int_to_ptr.vmem [resolvable:$true] %s182_s7 }
  0x10   : > { %s705_s8 = scalar_lea.vmem %s183_s7, 128  ;;  %p713_p3 = scmp.lt.s32.totalorder %s183_s7, %s183_s7 }
  0x11   : > { %p624_p12 = pnand %p631_p9, %p623_p11  ;;  %p706_p0 = scmp.ne.s32.totalorder %s183_s7, %s705_s8 }
  0x12   : > { %p714_p4 = scmp.lt.s32.totalorder %s705_s8, %s705_s8 }
  0x13   : > { %p696_p13 = pneg %p624_p12 }
  0x14   : > { %p715_p6 = por %p714_p4, %p713_p3 }
  0x15   : > { %p708_p1 = pnand %p706_p0, %p696_p13 }
  0x17   : > { %p709_p2 = pneg %p708_p1 }
  0x19   : > { %p716_p7 = pnand %p715_p6, %p709_p2 }
  0x1b   : > { %719 = shalt.err (!%p716_p7)
}
  0x1c   : > { %626 = dma.hbm_to_vmem [thread:$0]  (!%p624_p12), %s1015_s4, 128, %s183_s7, [#allocation3]  }
  0x1d   : > { %203 = sbr.rel (%p880_p10) target bundleno = 445 (0x1bd), region = 40 }
  0x22   : > { %763 = dma.done.wait (%p631_p9), [#allocation3], 128  }
  0x23   : > { %765 = vsyncadd (%p631_p9), [#allocation3], 4294967168  ;;  %v787_v0 = vmov 2   ;;  %v788_v1 = vmov 0   ;;  %v250_v2 = vld [vmem:[%s1012_s1] sm:$0xff]  ;;  %v789_v3 = vmov 3   ;;  %v257_v9 = vlaneseq }
  0x24   : > { %682 = vset.pattern.permute.xlu1 %v787_v0  ;;  %680 = vset.pattern.permute.xlu0 %v788_v1  ;;  %v790_v4 = vmov 1   ;;  %v904_v5 = vld [vmem:[%s1013_s2] sm:$0xff]  ;;  %v791_v6 = vmov 6   ;;  %v792_v7 = vmov 7   ;;  %v793_v8 = vmov 8   ;;  %p231_p6 = scmp.lt.s32.totalorder %s852_s22, 1 }
  0x25   : > { %304 = vperm.xlu1 %682, %v250_v2   ;;  %253 = vperm.xlu0 %680, %v250_v2   ;;  %v258_v10 = vshrl.u32 %v257_v9, 7  ;;  %s794_s26 = smov 1   ;;  %s795_s30 = smov 127   ;;  %v243_v54 = vld [vmem:[%s1014_s3] sm:$0xff]  ;;  %v796_v55 = vmov 4   ;;  %v797_v56 = vmov 5  }
  0x26   : > { %s232_s15 = scalar_select %p231_p6, %s852_s22, 1  ;;  %v947_v61 = vand.u32 127, %v257_v9  ;;  %v236_v62 = vld [vmem:[#allocation2] ss:$4 sm:$0x3] }
  0x27   : > { %v919_v11 = vsub.s32 0, %v258_v10  ;;  %v263_v12 = vsub.s32 4, %v258_v10  ;;  %v921_v13 = vsub.s32 1, %v258_v10  ;;  %v287_v14 = vsub.s32 5, %v258_v10  ;;  %s798_s8 = smov 16   ;;  %s799_s9 = smov 112  }
  0x28   : > { %s615_s16 = sshll.u32 %s232_s15, 3  ;;  %v309_v16 = vsub.s32 2, %v258_v10  ;;  %v313_v17 = vsub.s32 6, %v258_v10  ;;  %v335_v18 = vsub.s32 3, %v258_v10  ;;  %v339_v19 = vsub.s32 7, %v258_v10  ;;  %s228_s10 = sand.u32 1, %s776_s19  }
  0x29   : > { %683 = vset.pattern.permute.xlu1 %v789_v3  ;;  %681 = vset.pattern.permute.xlu0 %v790_v4  ;;  %s235_s25 = scalar_lea.vmem %s1011_s0, %s615_s16  ;;  %vm361_vm0 = vcmp.lt.s32.totalorder %v947_v61, 1  ;;  %v372_v4 = vrot.slane %v236_v62, %v921_v13  ;;  %vm381_vm1 = vcmp.lt.s32.totalorder %v947_v61, 127  ;;  %vm449_vm2 = vcmp.lt.s32.totalorder %v947_v61, 16  ;;  %s607_s11 = sshll.u32 %s228_s10, 4 }
  0x2a   : > { %330 = vperm.xlu1 %683, %v250_v2   ;;  %278 = vperm.xlu0 %681, %v250_v2   ;;  %v249_v15 = vld [vmem:[%s235_s25] sm:$0xff]  ;;  %vm493_vm3 = vcmp.lt.s32.totalorder %v947_v61, 112  ;;  %s616_s12 = sshll.u32 %s852_s22, 8  ;;  %s230_s13 = scalar_lea.vmem [#allocation5], %s607_s11 }
  0x2b   : > { %v260_v20 = vrot.slane %v249_v15, %v919_v11  ;;  %v264_v21 = vrot.slane %v249_v15, %v263_v12  ;;  %v284_v22 = vrot.slane %v249_v15, %v921_v13  ;;  %v288_v23 = vrot.slane %v249_v15, %v287_v14  ;;  %s530_s14 = sshll.u32 %s230_s13, 4  ;;  %s974_s17 = scalar_lea.hbm %s1016_s5, %s616_s12  ;;  %s531_s14 = int_to_ptr.vmem [resolvable:$true] %s530_s14 }
  0x2c   : > { %v310_v24 = vrot.slane %v249_v15, %v309_v16  ;;  %v314_v25 = vrot.slane %v249_v15, %v313_v17  ;;  %v336_v28 = vrot.slane %v249_v15, %v335_v18  ;;  %v340_v29 = vrot.slane %v249_v15, %v339_v19  ;;  %s516_s23 = scalar_lea.sflag [#allocation4], %s228_s10  ;;  %s720_s25 = scalar_lea.vmem %s531_s14, 256 }
  0x2d   : > { %v270_v30 = vrot.slane %v260_v20, %v919_v11  ;;  %v274_v31 = vrot.slane %v264_v21, %v919_v11  ;;  %v294_v32 = vrot.slane %v284_v22, %v921_v13  ;;  %v298_v33 = vrot.slane %v288_v23, %v921_v13  ;;  %p721_p8 = scmp.ne.s32.totalorder %s531_s14, %s720_s25  ;;  %s800_s22 = smov [#allocation5]  }
  0x2e   : > { %684 = vset.pattern.permute.xlu1 %v788_v1  ;;  %430 = vperm.xlu0 %681, %v904_v5   ;;  %v320_v34 = vrot.slane %v310_v24, %v309_v16  ;;  %v324_v35 = vrot.slane %v314_v25, %v309_v16  ;;  %v346_v36 = vrot.slane %v336_v28, %v335_v18 }
  0x2f   : > { %424 = vperm.xlu1 %684, %v904_v5   ;;  %v350_v37 = vrot.slane %v340_v29, %v335_v18  ;;  %p722_p9 = pnand %p721_p8, %p869_p5 }
  0x31   : > { %p723_p10 = pneg %p722_p9 }
  0x32   : > { %686 = vset.pattern.permute.xlu0 %v791_v6 }
  0x33   : > { %685 = vset.pattern.permute.xlu1 %v787_v0  ;;  %468 = vperm.xlu0 %686, %v904_v5   ;;  %v368_v0 = vrot.slane %v236_v62, %v919_v11 }
  0x34   : > { %438 = vperm.xlu1 %685, %v904_v5  }
  0x37   : > { %689 = vset.pattern.permute.xlu0 %v789_v3 }
  0x38   : > { %687 = vset.pattern.permute.xlu1 %v792_v7 }
  0x39   : > { %474 = vperm.xlu1 %687, %v904_v5  }
  0x3d   : > { %688 = vset.pattern.permute.xlu1 %v793_v8 }
  0xa0   : > { %v254_v26 = vpop.permute.xlu0 %253  ;;  %v305_v27 = vpop.permute.xlu1 %304 }
  0xa1   : > { %v275_v40 = vmul.f32 %v270_v30, %v254_v26  ;;  %v276_v41 = vmul.f32 %v274_v31, %v254_v26  ;;  %v325_v44 = vmul.f32 %v320_v34, %v305_v27  ;;  %v326_v45 = vmul.f32 %v324_v35, %v305_v27 }
  0xa5   : > { %v279_v38 = vpop.permute.xlu0 %278  ;;  %v331_v39 = vpop.permute.xlu1 %330 }
  0xa6   : > { %v299_v42 = vmul.f32 %v294_v32, %v279_v38  ;;  %v300_v43 = vmul.f32 %v298_v33, %v279_v38  ;;  %v351_v48 = vmul.f32 %v346_v36, %v331_v39  ;;  %v352_v49 = vmul.f32 %v350_v37, %v331_v39 }
  0xa8   : > { %v301_v46 = vadd.f32 %v299_v42, %v275_v40  ;;  %v302_v47 = vadd.f32 %v300_v43, %v276_v41 }
  0xa9   : > { %v431_v58 = vpop.permute.xlu0 %430 }
  0xaa   : > { %v327_v50 = vadd.f32 %v325_v44, %v301_v46  ;;  %v328_v51 = vadd.f32 %v326_v45, %v302_v47  ;;  %v425_v57 = vpop.permute.xlu1 %424 }
  0xac   : > { %v929_v52 = vadd.f32 %v351_v48, %v327_v50  ;;  %v931_v53 = vadd.f32 %v352_v49, %v328_v51 }
  0xae   : > { %357 = vrot.lane.b32.xlu0 %v931_v53, %s794_s26  ;;  %355 = vrot.lane.b32.xlu1 %v929_v52, %s794_s26  ;;  %v469_v60 = vpop.permute.xlu0 %468  ;;  %v433_v18 = vmul.f32 %v431_v58, %v929_v52  ;;  %v434_v24 = vmul.f32 %v431_v58, %v931_v53  ;;  %s724_s26 = sshll.u32 %s800_s22, 4  ;;  %s725_s26 = int_to_ptr.vmem [resolvable:$false] %s724_s26 }
  0xaf   : > { %v439_v59 = vpop.permute.xlu1 %438  ;;  %p727_p11 = scmp.lt.s32.totalorder %s531_s14, %s725_s26 }
  0xb2   : > { %379 = vrot.lane.b32.xlu0 %v931_v53, %s795_s30  ;;  %377 = vrot.lane.b32.xlu1 %v929_v52, %s795_s30  ;;  %s726_s30 = scalar_lea.vmem %s725_s26, 512 }
  0xb3   : > { %p728_p12 = scmp.lt.s32.totalorder %s726_s30, %s720_s25 }
  0xb4   : > { %v475_v63 = vpop.permute.xlu1 %474 }
  0xb5   : > { %v477_v31 = vmul.f32 %v475_v63, %v929_v52  ;;  %v478_v32 = vmul.f32 %v475_v63, %v931_v53  ;;  %p729_p13 = por %p728_p12, %p727_p11 }
  0xb6   : > { %400 = vperm.xlu0 %689, %v904_v5   ;;  %482 = vperm.xlu1 %688, %v904_v5  }
  0xb7   : > { %p730_p0 = pnand %p729_p13, %p723_p10 }
  0xba   : > { %690 = vset.pattern.permute.xlu1 %v796_v55  ;;  %692 = vset.pattern.permute.xlu0 %v788_v1  ;;  %v238_v1 = vld [vmem:[#allocation2 + $0x1] ss:$4 sm:$0x3] }
  0xbb   : > { %406 = vperm.xlu1 %690, %v904_v5   ;;  %246 = vperm.xlu0 %692, %v243_v54   ;;  %v392_v9 = vrot.slane %v238_v1, %v921_v13 }
  0xbf   : > { %691 = vset.pattern.permute.xlu1 %v797_v56  ;;  %693 = vset.pattern.permute.xlu0 %v793_v8  ;;  %v388_v8 = vrot.slane %v238_v1, %v919_v11  ;;  %v240_v56 = vld [vmem:[#allocation2 + $0x2] ss:$4 sm:$0x3] }
  0xc0   : > { %414 = vperm.xlu1 %691, %v904_v5  }
 0x120   : > { %v358_v2 = vpop.permute.xlu0 %357  ;;  %v356_v3 = vpop.permute.xlu1 %355 }
 0x121   : > { %v362_v6 = vsel %vm361_vm0, %v356_v3, %v358_v2  ;;  %v363_v5 = vsel %vm361_vm0, %v358_v2, %v356_v3 }
 0x122   : > { %v375_v7 = vmul.f32 %v368_v0, %v363_v5  ;;  %v376_v10 = vmul.f32 %v372_v4, %v362_v6 }
 0x124   : > { %v427_v12 = vmul.f32 %v425_v57, %v375_v7  ;;  %v380_v14 = vpop.permute.xlu0 %379  ;;  %v378_v15 = vpop.permute.xlu1 %377  ;;  %v428_v21 = vmul.f32 %v425_v57, %v376_v10  ;;  %v471_v28 = vmul.f32 %v469_v60, %v375_v7  ;;  %v472_v29 = vmul.f32 %v469_v60, %v376_v10  ;;  %v242_v60 = vld [vmem:[#allocation2 + $0x3] ss:$4 sm:$0x3] }
 0x125   : > { %v382_v16 = vsel %vm381_vm1, %v378_v15, %v380_v14  ;;  %v383_v17 = vsel %vm381_vm1, %v380_v14, %v378_v15  ;;  %v456_v57 = vrot.slane %v240_v56, %v919_v11  ;;  %v500_v1 = vrot.slane %v242_v60, %v919_v11 }
 0x126   : > { %v395_v19 = vmul.f32 %v388_v8, %v382_v16  ;;  %v396_v20 = vmul.f32 %v392_v9, %v383_v17  ;;  %v435_v22 = vadd.f32 %v433_v18, %v427_v12  ;;  %v436_v27 = vadd.f32 %v434_v24, %v428_v21 }
 0x127   : > { %v479_v34 = vadd.f32 %v477_v31, %v471_v28  ;;  %v480_v35 = vadd.f32 %v478_v32, %v472_v29  ;;  %v504_v2 = vrot.slane %v242_v60, %v921_v13 }
 0x128   : > { %v441_v23 = vmul.f32 %v439_v59, %v395_v19  ;;  %v442_v26 = vmul.f32 %v439_v59, %v396_v20 }
 0x12a   : > { %v443_v25 = vadd.f32 %v441_v23, %v435_v22  ;;  %v444_v30 = vadd.f32 %v442_v26, %v436_v27 }
 0x12c   : > { %445 = vrot.lane.b32.xlu1 %v443_v25, %s798_s8 }
 0x130   : > { %447 = vrot.lane.b32.xlu1 %v444_v30, %s798_s8 }
 0x131   : > { %v483_v33 = vpop.permute.xlu1 %482  ;;  %v401_v41 = vpop.permute.xlu0 %400 }
 0x132   : > { %v485_v36 = vmul.f32 %v483_v33, %v395_v19  ;;  %v486_v37 = vmul.f32 %v483_v33, %v396_v20  ;;  %v403_v44 = vmul.f32 %v401_v41, %v375_v7  ;;  %v404_v45 = vmul.f32 %v401_v41, %v376_v10 }
 0x134   : > { %v487_v38 = vadd.f32 %v485_v36, %v479_v34  ;;  %v488_v39 = vadd.f32 %v486_v37, %v480_v35 }
 0x136   : > { %v407_v40 = vpop.permute.xlu1 %406  ;;  %489 = vrot.lane.b32.xlu0 %v487_v38, %s799_s9  ;;  %491 = vrot.lane.b32.xlu1 %v488_v39, %s799_s9  ;;  %v247_v62 = vpop.permute.xlu0 %246 }
 0x137   : > { %v409_v42 = vmul.f32 %v407_v40, %v929_v52  ;;  %v410_v43 = vmul.f32 %v407_v40, %v931_v53  ;;  %v460_v52 = vrot.slane %v240_v56, %v921_v13 }
 0x139   : > { %v411_v47 = vadd.f32 %v409_v42, %v403_v44  ;;  %v412_v48 = vadd.f32 %v410_v43, %v404_v45 }
 0x13b   : > { %v415_v46 = vpop.permute.xlu1 %414 }
 0x13c   : > { %v417_v49 = vmul.f32 %v415_v46, %v395_v19  ;;  %v418_v50 = vmul.f32 %v415_v46, %v396_v20 }
 0x13e   : > { %v419_v51 = vadd.f32 %v417_v49, %v411_v47  ;;  %v420_v54 = vadd.f32 %v418_v50, %v412_v48 }
 0x140   : > { %v421_v3 = vadd.f32 %v419_v51, %v247_v62  ;;  %v422_v4 = vadd.f32 %v420_v54, %v247_v62 }
 0x19e   : > { %v446_v55 = vpop.permute.xlu1 %445 }
 0x1a2   : > { %v448_v53 = vpop.permute.xlu1 %447 }
 0x1a3   : > { %v450_v58 = vsel %vm449_vm2, %v446_v55, %v448_v53  ;;  %v451_v59 = vsel %vm449_vm2, %v448_v53, %v446_v55 }
 0x1a4   : > { %v463_v63 = vmul.f32 %v456_v57, %v451_v59  ;;  %v464_v0 = vmul.f32 %v460_v52, %v450_v58 }
 0x1a6   : > { %v465_v9 = vadd.f32 %v463_v63, %v421_v3  ;;  %v466_v10 = vadd.f32 %v464_v0, %v422_v4 }
 0x1a8   : > { %v490_v6 = vpop.permute.xlu0 %489  ;;  %v492_v5 = vpop.permute.xlu1 %491 }
 0x1a9   : > { %v494_v7 = vsel %vm493_vm3, %v490_v6, %v492_v5  ;;  %v495_v8 = vsel %vm493_vm3, %v492_v5, %v490_v6 }
 0x1aa   : > { %v507_v12 = vmul.f32 %v500_v1, %v494_v7  ;;  %v508_v61 = vmul.f32 %v504_v2, %v495_v8 }
 0x1ac   : > { %v509_v14 = vadd.f32 %v507_v12, %v465_v9  ;;  %v510_v15 = vadd.f32 %v508_v61, %v466_v10 }
 0x1ae   : > { %v511_v11 = vmax.f32 %v509_v14, 0.0  ;;  %v512_v16 = vmax.f32 %v510_v15, 0.0 }
 0x1b0   : > { %513 = vst [vmem:[%s230_s13] sm:$0xff] %v511_v11  ;;  %514 = vst [vmem:[%s230_s13 + $0x8] sm:$0xff] %v512_v16 }
 0x1b1   : > { %733 = shalt.err (!%p730_p0)
}
 0x1b2   : > { %s734_s6 = scalar_lea.hbm %s974_s17, 256  ;;  %s738_s9 = scalar_lea.hbm %s1016_s5, 512 }
 0x1b3   : > { %p735_p1 = scmp.ne.s32.totalorder %s974_s17, %s734_s6  ;;  %p739_p4 = scmp.lt.s32.totalorder %s974_s17, %s1016_s5 }
 0x1b4   : > { %p740_p7 = scmp.lt.s32.totalorder %s738_s9, %s734_s6 }
 0x1b5   : > { %p736_p2 = pnand %p735_p1, %p869_p5 }
 0x1b6   : > { %p741_p6 = por %p740_p7, %p739_p4 }
 0x1b7   : > { %p737_p3 = pneg %p736_p2 }
 0x1b9   : > { %p742_p8 = pnand %p741_p6, %p737_p3 }
 0x1bb   : > { %745 = shalt.err (!%p742_p8)
}
 0x1bc   : > { %621 = dma.vmem_to_hbm [thread:$0]  (%p869_p5), %s531_s14, 256, %s974_s17, %s516_s23  }
 0x1bd PF: > { %p633_p9 = scmp.ge.s32.totalorder %s784_s21, 2  ;;  %s542_s12 = sand.u32 1, %s772_s18  }
 0x1be   : > { %p1020_p10 = scmp.ne.s32.totalorder %s1018_s29, 0  ;;  %s543_s13 = scalar_lea.sflag [#allocation4], %s542_s12 }
 0x1c0   : > { %p628_p11 = pnand %p633_p9, %p1020_p10 }
 0x1c2   : > { %p629_p12 = pneg %p628_p11 }
 0x1c4   : > { %767 = dma.done.wait (%p629_p12), %s543_s13, 256  }
 0x1c5   : > { %769 = vsyncadd (%p629_p12), %s543_s13, 4294967040  ;;  %p16_p13 = scmp.ge.s32.totalorder %s856_s24, 4   ;;  %s1021_s18 = smov %s776_s19 }
 0x1c6   : > { %s1022_s19 = smov %s780_s20  ;;  %s1023_s20 = smov %s867_s27 }
 0x1c7   : > { %s1024_s21 = smov %s856_s24  ;;  %18 = sbr.rel (!%p16_p13) target bundleno = 4 (0x4), region = 83 }
 0x1cc   :  { %548 = vsyncpa [#allocation3], 1 }
 0x1cd   :  { %550 = vsyncpa [#allocation3 + $0x1], 1 }
 0x1ce   :  { %551 = vsyncpa [#allocation4], 1 }
 0x1cf   :  { %553 = vsyncpa [#allocation4 + $0x1], 1 }

</bundles_post_ra>
